<compile_context>
chip_gen: v5e
topology: v5e:2x2
jax: 0.10.0
libtpu: 0.0.40
codegen_flags: <defaults>
</compile_context>

<pallas_src>
import functools

import jax
import jax.numpy as jnp
from jax.experimental import pallas as pl
from jax.experimental.pallas import tpu as pltpu


STEM_C = 16      # stem output channels
WIDTH = 32       # bottleneck inner width
GROUPS = 8       # cardinality
OUT_C = 64       # bottleneck output channels (feature dim after flatten)

_VMEM_LIMIT = 32 * 1024 * 1024   # portable cap (well under v7x's 64 MiB physical)
_TM_MAX = 512                    # ~85% of HBM roofline per pipeline measurements


def _round_up(x, m):
    return ((x + m - 1) // m) * m


# ----------------------------- Pallas kernels ------------------------------ #

def _mm_bias_act_kernel(a_ref, w_ref, b_ref, o_ref, *, relu):
    # (tm, K) bf16 @ (K, N) bf16 -> f32 acc, + folded-BN bias, optional ReLU.
    acc = jnp.dot(a_ref[...], w_ref[...], preferred_element_type=jnp.float32)
    y = acc + b_ref[...]
    if relu:
        y = jnp.maximum(y, 0.0)
    o_ref[...] = y.astype(o_ref.dtype)


def _bottleneck_tail_kernel(a_ref, id_ref, wg_ref, bg_ref, wc_ref, wd_ref,
                            b_ref, o_ref):
    # Fused: block-diagonal grouped 3x3 conv (+BN+ReLU), 1x1 expand, 1x1
    # projection shortcut, residual add, final ReLU. Intermediates stay in vregs.
    h = jnp.dot(a_ref[...], wg_ref[...], preferred_element_type=jnp.float32)
    h = jnp.maximum(h + bg_ref[...], 0.0)                       # (tm, WIDTH) f32
    acc = jnp.dot(h.astype(wc_ref.dtype), wc_ref[...],
                  preferred_element_type=jnp.float32)           # expand
    acc += jnp.dot(id_ref[...], wd_ref[...],
                   preferred_element_type=jnp.float32)          # proj shortcut
    o_ref[...] = jnp.maximum(acc + b_ref[...], 0.0).astype(o_ref.dtype)


def _avg_pool_kernel(x_ref, o_ref):
    # Global average pool for one batch element: (1, HW, C) -> (1, 1, C).
    o_ref[...] = jnp.mean(x_ref[...], axis=1, keepdims=True)


# ----------------------------- kernel wrappers ------------------------------ #

def matmul_bias_act(a, w, bias, relu=False, tm_max=_TM_MAX):
    # a: (M, K) f32, w: (K, N) f32 (BN scale pre-folded), bias: (N,) f32.
    M, K = a.shape
    N = w.shape[1]
    tm = min(tm_max, _round_up(M, 8))
    Mp = _round_up(M, tm)
    if Mp != M:
        a = jnp.pad(a, ((0, Mp - M), (0, 0)))
    a = a.astype(jnp.bfloat16)
    w = w.astype(jnp.bfloat16)
    b2 = bias.reshape(1, N).astype(jnp.float32)
    out = pl.pallas_call(
        functools.partial(_mm_bias_act_kernel, relu=relu),
        out_shape=jax.ShapeDtypeStruct((Mp, N), jnp.float32),
        grid=(Mp // tm,),
        in_specs=[
            pl.BlockSpec((tm, K), lambda i: (i, 0)),
            pl.BlockSpec((K, N), lambda i: (0, 0)),
            pl.BlockSpec((1, N), lambda i: (0, 0)),
        ],
        out_specs=pl.BlockSpec((tm, N), lambda i: (i, 0)),
        compiler_params=pltpu.CompilerParams(
            dimension_semantics=("parallel",),
            vmem_limit_bytes=_VMEM_LIMIT),
    )(a, w, b2)
    return out[:M] if Mp != M else out


def bottleneck_tail(a, identity, wg, bg, wc, wd, bias, tm_max=_TM_MAX):
    # a: (M, 9*WIDTH) im2col slab; identity: (M, STEM_C);
    # wg: (9*WIDTH, WIDTH) block-diagonal grouped weight (BN folded);
    # wc: (WIDTH, OUT_C), wd: (STEM_C, OUT_C) (BN folded); bias = b_c + b_d.
    M, Kg = a.shape
    Kd = identity.shape[1]
    Kc, N = wc.shape
    tm = min(tm_max, _round_up(M, 8))
    Mp = _round_up(M, tm)
    if Mp != M:
        a = jnp.pad(a, ((0, Mp - M), (0, 0)))
        identity = jnp.pad(identity, ((0, Mp - M), (0, 0)))
    a = a.astype(jnp.bfloat16)
    identity = identity.astype(jnp.bfloat16)
    wg = wg.astype(jnp.bfloat16)
    wc = wc.astype(jnp.bfloat16)
    wd = wd.astype(jnp.bfloat16)
    bg2 = bg.reshape(1, Kc).astype(jnp.float32)
    b2 = bias.reshape(1, N).astype(jnp.float32)
    out = pl.pallas_call(
        _bottleneck_tail_kernel,
        out_shape=jax.ShapeDtypeStruct((Mp, N), jnp.float32),
        grid=(Mp // tm,),
        in_specs=[
            pl.BlockSpec((tm, Kg), lambda i: (i, 0)),
            pl.BlockSpec((tm, Kd), lambda i: (i, 0)),
            pl.BlockSpec((Kg, Kc), lambda i: (0, 0)),
            pl.BlockSpec((1, Kc), lambda i: (0, 0)),
            pl.BlockSpec((Kc, N), lambda i: (0, 0)),
            pl.BlockSpec((Kd, N), lambda i: (0, 0)),
            pl.BlockSpec((1, N), lambda i: (0, 0)),
        ],
        out_specs=pl.BlockSpec((tm, N), lambda i: (i, 0)),
        compiler_params=pltpu.CompilerParams(
            dimension_semantics=("parallel",),
            vmem_limit_bytes=_VMEM_LIMIT),
    )(a, identity, wg, bg2, wc, wd, b2)
    return out[:M] if Mp != M else out


def global_avg_pool(x):
    # x: (N, HW, C) -> (N, C), one batch element per grid step (parallel).
    N, HW, C = x.shape
    out = pl.pallas_call(
        _avg_pool_kernel,
        out_shape=jax.ShapeDtypeStruct((N, 1, C), jnp.float32),
        grid=(N,),
        in_specs=[pl.BlockSpec((1, HW, C), lambda n: (n, 0, 0))],
        out_specs=pl.BlockSpec((1, 1, C), lambda n: (n, 0, 0)),
        compiler_params=pltpu.CompilerParams(
            dimension_semantics=("parallel",),
            vmem_limit_bytes=_VMEM_LIMIT),
    )(x)
    # TODO(synk): for large H*W, tile the HW axis with an accumulator as well.
    return out.reshape(N, C)


# ----------------------------- JAX glue (layout) ---------------------------- #

def im2col(x, kh, kw, stride, pad, pad_value=0.0):
    # x: NHWC. Returns (N, Ho, Wo, kh*kw*C); column order = ((i*kw+j)*C + c).
    # TODO(synk): for realistic image sizes, assemble patches inside the kernel
    # (K-tiled, scalar-prefetched offsets) to avoid the kh*kw x HBM slab.
    x = jnp.pad(x, ((0, 0), (pad, pad), (pad, pad), (0, 0)),
                constant_values=pad_value)
    N, H, W, C = x.shape
    Ho = (H - kh) // stride + 1
    Wo = (W - kw) // stride + 1
    cols = []
    for i in range(kh):
        for j in range(kw):
            cols.append(x[:, i:i + stride * (Ho - 1) + 1:stride,
                          j:j + stride * (Wo - 1) + 1:stride, :])
    return jnp.concatenate(cols, axis=-1), Ho, Wo


def maxpool_3x3_s2_p1(x):
    # Memory-bound glue: pairwise jnp.maximum chain, fused by XLA (per review,
    # avoids materializing a 9x stacked tensor in HBM).
    N, H, W, C = x.shape
    xp = jnp.pad(x, ((0, 0), (1, 1), (1, 1), (0, 0)),
                 constant_values=-jnp.inf)
    Ho = (H + 2 - 3) // 2 + 1
    Wo = (W + 2 - 3) // 2 + 1
    out = None
    for i in range(3):
        for j in range(3):
            s = xp[:, i:i + 2 * (Ho - 1) + 1:2, j:j + 2 * (Wo - 1) + 1:2, :]
            out = s if out is None else jnp.maximum(out, s)
    return out


def fold_bn(gamma, beta, mean, var, eps=1e-5):
    scale = gamma / jnp.sqrt(var + eps)
    bias = beta - mean * scale
    return scale, bias


# ----------------------------- parameters ----------------------------------- #

def init_params(key):
    ks = jax.random.split(key, 10)

    def nrm(k, shape, s=0.1):
        return s * jax.random.normal(k, shape, jnp.float32)

    def bn(k, c):
        k1, k2, k3, k4 = jax.random.split(k, 4)
        gamma = 1.0 + 0.1 * jax.random.normal(k1, (c,), jnp.float32)
        beta = 0.1 * jax.random.normal(k2, (c,), jnp.float32)
        mean = 0.1 * jax.random.normal(k3, (c,), jnp.float32)
        var = jnp.abs(jax.random.normal(k4, (c,), jnp.float32)) + 0.5
        return gamma, beta, mean, var

    cg = WIDTH // GROUPS
    return {
        "conv1_w": nrm(ks[0], (7, 7, 3, STEM_C)),          # HWIO
        "bn1": bn(ks[1], STEM_C),
        "w_a": nrm(ks[2], (STEM_C, WIDTH)),                 # 1x1 reduce
        "bn_a": bn(ks[3], WIDTH),
        "w_b": nrm(ks[4], (GROUPS, 3, 3, cg, cg)),          # grouped 3x3
        "bn_b": bn(ks[5], WIDTH),
        "w_c": nrm(ks[6], (WIDTH, OUT_C)),                  # 1x1 expand
        "bn_c": bn(ks[7], OUT_C),
        "w_d": nrm(ks[8], (STEM_C, OUT_C)),                 # 1x1 downsample
        "bn_d": bn(ks[9], OUT_C),
    }


def prepare_inference_params(p):
    # Fold every BN scale into the preceding weight once (host/XLA-side, tiny
    # tensors); kernels only apply a bias add (+ReLU).
    s1, b1 = fold_bn(*p["bn1"])
    sa, ba = fold_bn(*p["bn_a"])
    sb, bb = fold_bn(*p["bn_b"])
    sc, bc = fold_bn(*p["bn_c"])
    sd, bd = fold_bn(*p["bn_d"])

    cg = WIDTH // GROUPS
    # Block-diagonal grouped weight matching im2col column order (i,j,g,c):
    # W[(i*3+j)*WIDTH + g*cg + ci, g*cg + co] = w_b[g,i,j,ci,co]
    wb = jnp.transpose(p["w_b"], (1, 2, 0, 3, 4))          # (3,3,G,cg,cg)
    eye = jnp.eye(GROUPS, dtype=wb.dtype)
    w_bd = (wb[:, :, :, :, None, :] *
            eye[None, None, :, None, :, None]).reshape(9 * WIDTH, WIDTH)

    return {
        "w1": p["conv1_w"].reshape(-1, STEM_C) * s1[None, :],
        "b1": b1,
        "wa": p["w_a"] * sa[None, :],
        "ba": ba,
        "wg": w_bd * sb[None, :],
        "bg": bb,
        "wc": p["w_c"] * sc[None, :],
        "wd": p["w_d"] * sd[None, :],
        "bcd": bc + bd,
    }


# ----------------------------- forward pass --------------------------------- #

def resnext_bottom_forward(x_nchw, q):
    x = jnp.transpose(x_nchw, (0, 2, 3, 1)).astype(jnp.float32)  # -> NHWC
    N = x.shape[0]

    # ---- stem: 7x7/s2/p3 conv + BN + ReLU (fused matmul) ----
    cols, Ho, Wo = im2col(x, 7, 7, 2, 3)
    y = matmul_bias_act(cols.reshape(N * Ho * Wo, -1), q["w1"], q["b1"],
                        relu=True)
    x = y.reshape(N, Ho, Wo, STEM_C)

    # ---- maxpool 3x3/s2/p1 (XLA-fused maximum chain) ----
    x = maxpool_3x3_s2_p1(x)
    Nb, H, W, C = x.shape
    M = Nb * H * W
    identity = x.reshape(M, C)

    # ---- bottleneck: 1x1 reduce + BN + ReLU ----
    y = matmul_bias_act(identity, q["wa"], q["ba"], relu=True)
    y = y.reshape(Nb, H, W, WIDTH)

    # ---- fused: grouped 3x3 (block-diag) + BN + ReLU,
    #             1x1 expand + 1x1 proj shortcut + residual add + ReLU ----
    cols3, _, _ = im2col(y, 3, 3, 1, 1)                    # (Nb,H,W,9*WIDTH)
    y = bottleneck_tail(cols3.reshape(M, 9 * WIDTH), identity,
                        q["wg"], q["bg"], q["wc"], q["wd"], q["bcd"])

    # ---- adaptive avg pool to 1x1, then flatten(1) ----
    return global_avg_pool(y.reshape(Nb, H * W, OUT_C))    # (N, OUT_C)


# --------------------------------- main -------------------------------------- #

if __name__ == "__main__":
    params = init_params(jax.random.PRNGKey(0))
    infer_params = prepare_inference_params(params)
    x = jax.random.normal(jax.random.PRNGKey(0), (2, 3, 16, 16), jnp.float32)

    fwd = jax.jit(resnext_bottom_forward)
    out = fwd(x, infer_params)
    out = jax.block_until_ready(out)

    assert out.shape == (2, OUT_C), out.shape
    assert bool(jnp.all(jnp.isfinite(out)))
    print("KERNEL_OK")
</pallas_src>

<mosaic_0001>
module attributes {stable_mosaic.version = 11 : i64} {
  func.func @_mm_bias_act_kernel(%arg0: i32, %arg1: memref<128x147xbf16, #tpu.memory_space<vmem>>, %arg2: memref<147x16xbf16, #tpu.memory_space<vmem>>, %arg3: memref<1x16xf32, #tpu.memory_space<vmem>>, %arg4: memref<128x16xf32, #tpu.memory_space<vmem>>) attributes {dimension_semantics = [#tpu.dimension_semantics<parallel>], iteration_bounds = array<i64: 1>, scalar_prefetch = 0 : i64, scratch_operands = 0 : i64, tpu.core_type = #tpu.core_type<tc>, window_params = [{transform_indices = @transform_0, window_bounds = array<i64: 128, 147>}, {pipeline_mode = #tpu.pipeline_mode<synchronous>, transform_indices = @transform_1, window_bounds = array<i64: 147, 16>}, {pipeline_mode = #tpu.pipeline_mode<synchronous>, transform_indices = @transform_2, window_bounds = array<i64: 1, 16>}, {transform_indices = @transform_3, window_bounds = array<i64: 128, 16>}]} {
    %c0 = arith.constant 0 : index
    %c0_0 = arith.constant 0 : index
    %0 = vector.load %arg1[%c0, %c0_0] : memref<128x147xbf16, #tpu.memory_space<vmem>>, vector<128x147xbf16>
    %c0_1 = arith.constant 0 : index
    %c0_2 = arith.constant 0 : index
    %1 = vector.load %arg2[%c0_1, %c0_2] : memref<147x16xbf16, #tpu.memory_space<vmem>>, vector<147x16xbf16>
    %cst = arith.constant dense<0.000000e+00> : vector<128x16xf32>
    %2 = tpu.matmul %0, %1, %cst {dimension_numbers = #tpu.dot_dimension_numbers<[1], [0], [0], [1], [0, 0, 1, 1], [], []>} : vector<128x147xbf16>, vector<147x16xbf16>, vector<128x16xf32> -> vector<128x16xf32>
    %c0_3 = arith.constant 0 : index
    %c0_4 = arith.constant 0 : index
    %3 = vector.load %arg3[%c0_3, %c0_4] : memref<1x16xf32, #tpu.memory_space<vmem>>, vector<1x16xf32>
    %4 = vector.broadcast %3 : vector<1x16xf32> to vector<128x16xf32>
    %5 = arith.addf %2, %4 : vector<128x16xf32>
    %cst_5 = arith.constant 0.000000e+00 : f32
    %6 = vector.broadcast %cst_5 : f32 to vector<128x16xf32>
    %7 = arith.maximumf %5, %6 : vector<128x16xf32>
    %c0_6 = arith.constant 0 : index
    %c0_7 = arith.constant 0 : index
    %8 = vector.load %arg4[%c0_6, %c0_7] : memref<128x16xf32, #tpu.memory_space<vmem>>, vector<128x16xf32>
    tpu.vector_store %arg4[%c0_6, %c0_7], %7 {strides = array<i32>} : memref<128x16xf32, #tpu.memory_space<vmem>>, vector<128x16xf32>,
    return
  }
  func.func @transform_0(%arg0: i32) -> (i32, i32) {
    %c0_i32 = arith.constant 0 : i32
    %c0_i32_0 = arith.constant 0 : i32
    return %arg0, %c0_i32 : i32, i32
  }
  func.func @transform_1(%arg0: i32) -> (i32, i32) {
    %c0_i32 = arith.constant 0 : i32
    %c0_i32_0 = arith.constant 0 : i32
    %c0_i32_1 = arith.constant 0 : i32
    return %c0_i32, %c0_i32_0 : i32, i32
  }
  func.func @transform_2(%arg0: i32) -> (i32, i32) {
    %c0_i32 = arith.constant 0 : i32
    %c0_i32_0 = arith.constant 0 : i32
    %c0_i32_1 = arith.constant 0 : i32
    return %c0_i32, %c0_i32_0 : i32, i32
  }
  func.func @transform_3(%arg0: i32) -> (i32, i32) {
    %c0_i32 = arith.constant 0 : i32
    %c0_i32_0 = arith.constant 0 : i32
    return %arg0, %c0_i32 : i32, i32
  }
}

module attributes {stable_mosaic.version = 11 : i64} {
  func.func @_mm_bias_act_kernel(%arg0: i32, %arg1: memref<32x16xbf16, #tpu.memory_space<vmem>>, %arg2: memref<16x32xbf16, #tpu.memory_space<vmem>>, %arg3: memref<1x32xf32, #tpu.memory_space<vmem>>, %arg4: memref<32x32xf32, #tpu.memory_space<vmem>>) attributes {dimension_semantics = [#tpu.dimension_semantics<parallel>], iteration_bounds = array<i64: 1>, scalar_prefetch = 0 : i64, scratch_operands = 0 : i64, tpu.core_type = #tpu.core_type<tc>, window_params = [{transform_indices = @transform_0, window_bounds = array<i64: 32, 16>}, {pipeline_mode = #tpu.pipeline_mode<synchronous>, transform_indices = @transform_1, window_bounds = array<i64: 16, 32>}, {pipeline_mode = #tpu.pipeline_mode<synchronous>, transform_indices = @transform_2, window_bounds = array<i64: 1, 32>}, {transform_indices = @transform_3, window_bounds = array<i64: 32, 32>}]} {
    %c0 = arith.constant 0 : index
    %c0_0 = arith.constant 0 : index
    %0 = vector.load %arg1[%c0, %c0_0] : memref<32x16xbf16, #tpu.memory_space<vmem>>, vector<32x16xbf16>
    %c0_1 = arith.constant 0 : index
    %c0_2 = arith.constant 0 : index
    %1 = vector.load %arg2[%c0_1, %c0_2] : memref<16x32xbf16, #tpu.memory_space<vmem>>, vector<16x32xbf16>
    %cst = arith.constant dense<0.000000e+00> : vector<32x32xf32>
    %2 = tpu.matmul %0, %1, %cst {dimension_numbers = #tpu.dot_dimension_numbers<[1], [0], [0], [1], [0, 0, 1, 1], [], []>} : vector<32x16xbf16>, vector<16x32xbf16>, vector<32x32xf32> -> vector<32x32xf32>
    %c0_3 = arith.constant 0 : index
    %c0_4 = arith.constant 0 : index
    %3 = vector.load %arg3[%c0_3, %c0_4] : memref<1x32xf32, #tpu.memory_space<vmem>>, vector<1x32xf32>
    %4 = vector.broadcast %3 : vector<1x32xf32> to vector<32x32xf32>
    %5 = arith.addf %2, %4 : vector<32x32xf32>
    %cst_5 = arith.constant 0.000000e+00 : f32
    %6 = vector.broadcast %cst_5 : f32 to vector<32x32xf32>
    %7 = arith.maximumf %5, %6 : vector<32x32xf32>
    %c0_6 = arith.constant 0 : index
    %c0_7 = arith.constant 0 : index
    %8 = vector.load %arg4[%c0_6, %c0_7] : memref<32x32xf32, #tpu.memory_space<vmem>>, vector<32x32xf32>
    tpu.vector_store %arg4[%c0_6, %c0_7], %7 {strides = array<i32>} : memref<32x32xf32, #tpu.memory_space<vmem>>, vector<32x32xf32>,
    return
  }
  func.func @transform_0(%arg0: i32) -> (i32, i32) {
    %c0_i32 = arith.constant 0 : i32
    %c0_i32_0 = arith.constant 0 : i32
    return %arg0, %c0_i32 : i32, i32
  }
  func.func @transform_1(%arg0: i32) -> (i32, i32) {
    %c0_i32 = arith.constant 0 : i32
    %c0_i32_0 = arith.constant 0 : i32
    %c0_i32_1 = arith.constant 0 : i32
    return %c0_i32, %c0_i32_0 : i32, i32
  }
  func.func @transform_2(%arg0: i32) -> (i32, i32) {
    %c0_i32 = arith.constant 0 : i32
    %c0_i32_0 = arith.constant 0 : i32
    %c0_i32_1 = arith.constant 0 : i32
    return %c0_i32, %c0_i32_0 : i32, i32
  }
  func.func @transform_3(%arg0: i32) -> (i32, i32) {
    %c0_i32 = arith.constant 0 : i32
    %c0_i32_0 = arith.constant 0 : i32
    return %arg0, %c0_i32 : i32, i32
  }
}

module attributes {stable_mosaic.version = 11 : i64} {
  func.func @_bottleneck_tail_kernel(%arg0: i32, %arg1: memref<32x288xbf16, #tpu.memory_space<vmem>>, %arg2: memref<32x16xbf16, #tpu.memory_space<vmem>>, %arg3: memref<288x32xbf16, #tpu.memory_space<vmem>>, %arg4: memref<1x32xf32, #tpu.memory_space<vmem>>, %arg5: memref<32x64xbf16, #tpu.memory_space<vmem>>, %arg6: memref<16x64xbf16, #tpu.memory_space<vmem>>, %arg7: memref<1x64xf32, #tpu.memory_space<vmem>>, %arg8: memref<32x64xf32, #tpu.memory_space<vmem>>) attributes {dimension_semantics = [#tpu.dimension_semantics<parallel>], iteration_bounds = array<i64: 1>, scalar_prefetch = 0 : i64, scratch_operands = 0 : i64, tpu.core_type = #tpu.core_type<tc>, window_params = [{transform_indices = @transform_0, window_bounds = array<i64: 32, 288>}, {transform_indices = @transform_1, window_bounds = array<i64: 32, 16>}, {pipeline_mode = #tpu.pipeline_mode<synchronous>, transform_indices = @transform_2, window_bounds = array<i64: 288, 32>}, {pipeline_mode = #tpu.pipeline_mode<synchronous>, transform_indices = @transform_3, window_bounds = array<i64: 1, 32>}, {pipeline_mode = #tpu.pipeline_mode<synchronous>, transform_indices = @transform_4, window_bounds = array<i64: 32, 64>}, {pipeline_mode = #tpu.pipeline_mode<synchronous>, transform_indices = @transform_5, window_bounds = array<i64: 16, 64>}, {pipeline_mode = #tpu.pipeline_mode<synchronous>, transform_indices = @transform_6, window_bounds = array<i64: 1, 64>}, {transform_indices = @transform_7, window_bounds = array<i64: 32, 64>}]} {
    %c0 = arith.constant 0 : index
    %c0_0 = arith.constant 0 : index
    %0 = vector.load %arg1[%c0, %c0_0] : memref<32x288xbf16, #tpu.memory_space<vmem>>, vector<32x288xbf16>
    %c0_1 = arith.constant 0 : index
    %c0_2 = arith.constant 0 : index
    %1 = vector.load %arg3[%c0_1, %c0_2] : memref<288x32xbf16, #tpu.memory_space<vmem>>, vector<288x32xbf16>
    %cst = arith.constant dense<0.000000e+00> : vector<32x32xf32>
    %2 = tpu.matmul %0, %1, %cst {dimension_numbers = #tpu.dot_dimension_numbers<[1], [0], [0], [1], [0, 0, 1, 1], [], []>} : vector<32x288xbf16>, vector<288x32xbf16>, vector<32x32xf32> -> vector<32x32xf32>
    %c0_3 = arith.constant 0 : index
    %c0_4 = arith.constant 0 : index
    %3 = vector.load %arg4[%c0_3, %c0_4] : memref<1x32xf32, #tpu.memory_space<vmem>>, vector<1x32xf32>
    %4 = vector.broadcast %3 : vector<1x32xf32> to vector<32x32xf32>
    %5 = arith.addf %2, %4 : vector<32x32xf32>
    %cst_5 = arith.constant 0.000000e+00 : f32
    %6 = vector.broadcast %cst_5 : f32 to vector<32x32xf32>
    %7 = arith.maximumf %5, %6 : vector<32x32xf32>
    %8 = arith.truncf %7 : vector<32x32xf32> to vector<32x32xbf16>
    %c0_6 = arith.constant 0 : index
    %c0_7 = arith.constant 0 : index
    %9 = vector.load %arg5[%c0_6, %c0_7] : memref<32x64xbf16, #tpu.memory_space<vmem>>, vector<32x64xbf16>
    %cst_8 = arith.constant dense<0.000000e+00> : vector<32x64xf32>
    %10 = tpu.matmul %8, %9, %cst_8 {dimension_numbers = #tpu.dot_dimension_numbers<[1], [0], [0], [1], [0, 0, 1, 1], [], []>} : vector<32x32xbf16>, vector<32x64xbf16>, vector<32x64xf32> -> vector<32x64xf32>
    %c0_9 = arith.constant 0 : index
    %c0_10 = arith.constant 0 : index
    %11 = vector.load %arg2[%c0_9, %c0_10] : memref<32x16xbf16, #tpu.memory_space<vmem>>, vector<32x16xbf16>
    %c0_11 = arith.constant 0 : index
    %c0_12 = arith.constant 0 : index
    %12 = vector.load %arg6[%c0_11, %c0_12] : memref<16x64xbf16, #tpu.memory_space<vmem>>, vector<16x64xbf16>
    %cst_13 = arith.constant dense<0.000000e+00> : vector<32x64xf32>
    %13 = tpu.matmul %11, %12, %cst_13 {dimension_numbers = #tpu.dot_dimension_numbers<[1], [0], [0], [1], [0, 0, 1, 1], [], []>} : vector<32x16xbf16>, vector<16x64xbf16>, vector<32x64xf32> -> vector<32x64xf32>
    %14 = arith.addf %10, %13 : vector<32x64xf32>
    %c0_14 = arith.constant 0 : index
    %c0_15 = arith.constant 0 : index
    %15 = vector.load %arg7[%c0_14, %c0_15] : memref<1x64xf32, #tpu.memory_space<vmem>>, vector<1x64xf32>
    %16 = vector.broadcast %15 : vector<1x64xf32> to vector<32x64xf32>
    %17 = arith.addf %14, %16 : vector<32x64xf32>
    %cst_16 = arith.constant 0.000000e+00 : f32
    %18 = vector.broadcast %cst_16 : f32 to vector<32x64xf32>
    %19 = arith.maximumf %17, %18 : vector<32x64xf32>
    %c0_17 = arith.constant 0 : index
    %c0_18 = arith.constant 0 : index
    %20 = vector.load %arg8[%c0_17, %c0_18] : memref<32x64xf32, #tpu.memory_space<vmem>>, vector<32x64xf32>
    tpu.vector_store %arg8[%c0_17, %c0_18], %19 {strides = array<i32>} : memref<32x64xf32, #tpu.memory_space<vmem>>, vector<32x64xf32>,
    return
  }
  func.func @transform_0(%arg0: i32) -> (i32, i32) {
    %c0_i32 = arith.constant 0 : i32
    %c0_i32_0 = arith.constant 0 : i32
    return %arg0, %c0_i32 : i32, i32
  }
  func.func @transform_1(%arg0: i32) -> (i32, i32) {
    %c0_i32 = arith.constant 0 : i32
    %c0_i32_0 = arith.constant 0 : i32
    return %arg0, %c0_i32 : i32, i32
  }
  func.func @transform_2(%arg0: i32) -> (i32, i32) {
    %c0_i32 = arith.constant 0 : i32
    %c0_i32_0 = arith.constant 0 : i32
    %c0_i32_1 = arith.constant 0 : i32
    return %c0_i32, %c0_i32_0 : i32, i32
  }
  func.func @transform_3(%arg0: i32) -> (i32, i32) {
    %c0_i32 = arith.constant 0 : i32
    %c0_i32_0 = arith.constant 0 : i32
    %c0_i32_1 = arith.constant 0 : i32
    return %c0_i32, %c0_i32_0 : i32, i32
  }
  func.func @transform_4(%arg0: i32) -> (i32, i32) {
    %c0_i32 = arith.constant 0 : i32
    %c0_i32_0 = arith.constant 0 : i32
    %c0_i32_1 = arith.constant 0 : i32
    return %c0_i32, %c0_i32_0 : i32, i32
  }
  func.func @transform_5(%arg0: i32) -> (i32, i32) {
    %c0_i32 = arith.constant 0 : i32
    %c0_i32_0 = arith.constant 0 : i32
    %c0_i32_1 = arith.constant 0 : i32
    return %c0_i32, %c0_i32_0 : i32, i32
  }
  func.func @transform_6(%arg0: i32) -> (i32, i32) {
    %c0_i32 = arith.constant 0 : i32
    %c0_i32_0 = arith.constant 0 : i32
    %c0_i32_1 = arith.constant 0 : i32
    return %c0_i32, %c0_i32_0 : i32, i32
  }
  func.func @transform_7(%arg0: i32) -> (i32, i32) {
    %c0_i32 = arith.constant 0 : i32
    %c0_i32_0 = arith.constant 0 : i32
    return %arg0, %c0_i32 : i32, i32
  }
}

module attributes {stable_mosaic.version = 11 : i64} {
  func.func @_avg_pool_kernel(%arg0: i32, %arg1: memref<1x16x64xf32, #tpu.memory_space<vmem>>, %arg2: memref<1x1x64xf32, #tpu.memory_space<vmem>>) attributes {dimension_semantics = [#tpu.dimension_semantics<parallel>], iteration_bounds = array<i64: 2>, scalar_prefetch = 0 : i64, scratch_operands = 0 : i64, tpu.core_type = #tpu.core_type<tc>, window_params = [{transform_indices = @transform_0, window_bounds = array<i64: 1, 16, 64>}, {transform_indices = @transform_1, window_bounds = array<i64: 1, 1, 64>}]} {
    %c0 = arith.constant 0 : index
    %c0_0 = arith.constant 0 : index
    %c0_1 = arith.constant 0 : index
    %0 = vector.load %arg1[%c0, %c0_0, %c0_1] : memref<1x16x64xf32, #tpu.memory_space<vmem>>, vector<1x16x64xf32>
    %cst = arith.constant dense<0.000000e+00> : vector<1x64xf32>
    %1 = vector.multi_reduction <add>, %0, %cst [1] : vector<1x16x64xf32> to vector<1x64xf32>
    %2 = vector.shape_cast %1 : vector<1x64xf32> to vector<1x1x64xf32>
    %cst_2 = arith.constant 1.600000e+01 : f32
    %3 = vector.broadcast %cst_2 : f32 to vector<1x1x64xf32>
    %4 = arith.divf %2, %3 : vector<1x1x64xf32>
    %c0_3 = arith.constant 0 : index
    %c0_4 = arith.constant 0 : index
    %c0_5 = arith.constant 0 : index
    %5 = vector.load %arg2[%c0_3, %c0_4, %c0_5] : memref<1x1x64xf32, #tpu.memory_space<vmem>>, vector<1x1x64xf32>
    tpu.vector_store %arg2[%c0_3, %c0_4, %c0_5], %4 {strides = array<i32>} : memref<1x1x64xf32, #tpu.memory_space<vmem>>, vector<1x1x64xf32>,
    return
  }
  func.func @transform_0(%arg0: i32) -> (i32, i32, i32) {
    %c0_i32 = arith.constant 0 : i32
    %c0_i32_0 = arith.constant 0 : i32
    %c0_i32_1 = arith.constant 0 : i32
    return %arg0, %c0_i32, %c0_i32_0 : i32, i32, i32
  }
  func.func @transform_1(%arg0: i32) -> (i32, i32, i32) {
    %c0_i32 = arith.constant 0 : i32
    %c0_i32_0 = arith.constant 0 : i32
    %c0_i32_1 = arith.constant 0 : i32
    return %arg0, %c0_i32, %c0_i32_0 : i32, i32, i32
  }
}

</mosaic_0001>

<bundles_post_ra>
// kernel: resnext_bottom_forward.5
= control target key start
LH: loop header
LB: loop body
LE: loop exit
PB: predicated region body
PF: predicated region fallthrough
CT: control target
= control target key end

     0   :  { %vm41_vm0 = vcmask 130048   ;;  %vm71_vm1 = vcmask 261120   ;;  %s143_s1 = inlined_call_operand.vmem [shape: bf16[16,32], index: 1, kind: input, shape index: {}]   ;;  %s144_s0 = inlined_call_operand.vmem [shape: bf16[32,16], index: 0, kind: input, shape index: {}]   ;;  %s145_s2 = inlined_call_operand.vmem [shape: f32[1,32], index: 2, kind: input, shape index: {}]   ;;  %s146_s3 = inlined_call_operand.vmem [shape: f32[32,32], index: 3, kind: output, shape index: {}]  }
   0x1   :  { %v96_v0 = vld [vmem:[%s143_s1] sm:$0xff]  ;;  %v95_v2 = vld [vmem:[%s144_s0 + $0x8] sm:$0xff] }
   0x2   :  { %v94_v1 = vld [vmem:[%s144_s0] sm:$0xff]  ;;  %55 = vmatpush.bf16.msra.mxu0 %v96_v0  ;;  %97 = vmatpush.bf16.msra.mxu1 %v96_v0 }
   0x3   :  { %v98_v3 = vld [vmem:[%s145_s2] ss:$0 sm:$0xff] }
   0x5   :  { %92 = vmatmul.msk.bf16.vlgmr.msra.gmra.mxu0 %vm41_vm0, %v94_v1  ;;  %93 = vmatmul.msk.bf16.vlgmr.msra.gmra.mxu1 %vm41_vm0, %v95_v2 }
  0x82   :  { %v57_v4 = vpop.f32.mrf.mxu0  ;;  %v62_v5 = vpop.f32.mrf.mxu1 }
  0x83   :  { %v58_v6 = vadd.f32 %v98_v3, %v57_v4  ;;  %v63_v7 = vadd.f32 %v98_v3, %v62_v5 }
  0x85   :  { %v67_v8 = vmax.f32 %v58_v6, 0.0  ;;  %v69_v9 = vmax.f32 %v63_v7, 0.0 }
  0x87   :  { %72 = vst.msk [vmem:[%s146_s3] sm:$0xff] %vm71_vm1, %v67_v8 }
  0x88   :  { %74 = vst.msk [vmem:[%s146_s3 + $0x10] sm:$0xff] %vm71_vm1, %v69_v9 }
  0x8a   :  { %v59_v10 = vpop.f32.mrf.mxu0  ;;  %v64_v11 = vpop.f32.mrf.mxu1 }
  0x8b   :  { %v60_v12 = vadd.f32 %v98_v3, %v59_v10  ;;  %v65_v13 = vadd.f32 %v98_v3, %v64_v11 }
  0x8d   :  { %v68_v14 = vmax.f32 %v60_v12, 0.0  ;;  %v70_v15 = vmax.f32 %v65_v13, 0.0 }
  0x8f   :  { %73 = vst.msk [vmem:[%s146_s3 + $0x8] sm:$0xff] %vm71_vm1, %v68_v14 }
  0x90   :  { %75 = vst.msk [vmem:[%s146_s3 + $0x18] sm:$0xff] %vm71_vm1, %v70_v15 }

// kernel: resnext_bottom_forward.4
= control target key start
LH: loop header
LB: loop body
LE: loop exit
PB: predicated region body
PF: predicated region fallthrough
CT: control target
= control target key end

     0   :  { %vm208_vm0 = vcmask 1040384   ;;  %vm209_vm1 = vcmask 1041408   ;;  %v495_v2 = vmov 65535   ;;  %vm183_vm2 = vcmask 154624   ;;  %s735_s1 = inlined_call_operand.vmem [shape: bf16[147,16], index: 1, kind: input, shape index: {}]   ;;  %s736_s0 = inlined_call_operand.vmem [shape: bf16[128,147], index: 0, kind: input, shape index: {}]   ;;  %s737_s2 = inlined_call_operand.vmem [shape: f32[1,16], index: 2, kind: input, shape index: {}]   ;;  %s738_s3 = inlined_call_operand.vmem [shape: f32[128,16], index: 3, kind: output, shape index: {}]  }
   0x1   :  { %v481_v0 = vld [vmem:[%s735_s1 + $0x38] sm:$0xff]  ;;  %v49_v1 = vld [vmem:[%s735_s1 + $0x48] sm:$0x3]  ;;  %v210_v3 = vsel %vm208_vm0, 4294967295, %v495_v2  ;;  %v480_v5 = vld [vmem:[%s735_s1 + $0x30] sm:$0xff]  ;;  %vm329_vm3 = vcmask 130048  }
   0x2   :  { %v163_v4 = vunpack.c.l.b16 %v49_v1  ;;  %215 = vmatpush.bf16.msra.mxu0 %v481_v0  ;;  %483 = vmatpush.bf16.msra.mxu2 %v481_v0  ;;  %v211_v6 = vsel %vm209_vm1, %v210_v3, 0  ;;  %v479_v9 = vld [vmem:[%s735_s1 + $0x28] sm:$0xff]  ;;  %v482_v10 = vld [vmem:[%s735_s1 + $0x40] sm:$0xff]  ;;  %v468_v13 = vld [vmem:[%s736_s0 + $0x54] sm:$0xf] }
   0x3   :  { %v458_v11 = vld [vmem:[%s736_s0 + $0x4] sm:$0xf]  ;;  %v354_v12 = vld [vmem:[%s736_s0 + $0x8] sm:$0xf0]  ;;  %v394_v14 = vld [vmem:[%s736_s0 + $0x58] sm:$0xf0] }
   0x4   :  { %v173_v7 = vpack.c.b16 %v163_v4, %v163_v4  ;;  %v357_v15 = vor.u32 %v458_v11, %v354_v12  ;;  %v478_v16 = vld [vmem:[%s735_s1 + $0x20] sm:$0xff]  ;;  %v397_v17 = vor.u32 %v468_v13, %v394_v14  ;;  %v477_v18 = vld [vmem:[%s735_s1 + $0x18] sm:$0xff]  ;;  %v476_v19 = vld [vmem:[%s735_s1 + $0x10] sm:$0xff] }
   0x5   :  { %v475_v20 = vld [vmem:[%s735_s1 + $0x8] sm:$0xff]  ;;  %v460_v21 = vld [vmem:[%s736_s0 + $0x14] sm:$0xf]  ;;  %v362_v22 = vld [vmem:[%s736_s0 + $0x18] sm:$0xf0] }
   0x6   :  { %v213_v8 = vand.u32 %v211_v6, %v173_v7  ;;  %216 = vmatpush.bf16.msra.mxu0 %v480_v5  ;;  %484 = vmatpush.bf16.msra.mxu2 %v480_v5  ;;  %v470_v23 = vld [vmem:[%s736_s0 + $0x64] sm:$0xf]  ;;  %v402_v24 = vld [vmem:[%s736_s0 + $0x68] sm:$0xf0]  ;;  %v365_v25 = vor.u32 %v460_v21, %v362_v22  ;;  %v352_v27 = vld [vmem:[%s736_s0] sm:$0xf] }
   0x7   :  { %v474_v26 = vld [vmem:[%s735_s1] sm:$0xff]  ;;  %v459_v28 = vld [vmem:[%s736_s0 + $0x4] sm:$0xf0]  ;;  %v405_v31 = vor.u32 %v470_v23, %v402_v24  ;;  %v370_v35 = vld [vmem:[%s736_s0 + $0x28] sm:$0xf0] }
   0x8   :  { %270 = vmatpush.bf16.msra.mxu1 %v213_v8  ;;  %491 = vmatpush.bf16.msra.mxu3 %v213_v8  ;;  %v384_v29 = vld [vmem:[%s736_s0 + $0x40] sm:$0xf]  ;;  %v467_v30 = vld [vmem:[%s736_s0 + $0x44] sm:$0xf0]  ;;  %v353_v32 = vor.u32 %v459_v28, %v352_v27  ;;  %v462_v34 = vld [vmem:[%s736_s0 + $0x24] sm:$0xf] }
   0x9   :  { %v385_v33 = vor.u32 %v467_v30, %v384_v29  ;;  %v472_v36 = vld [vmem:[%s736_s0 + $0x74] sm:$0xf]  ;;  %v410_v37 = vld [vmem:[%s736_s0 + $0x78] sm:$0xf0]  ;;  %v373_v38 = vor.u32 %v462_v34, %v370_v35  ;;  %v360_v39 = vld [vmem:[%s736_s0 + $0x10] sm:$0xf] }
   0xa   :  { %217 = vmatpush.bf16.msra.mxu0 %v479_v9  ;;  %485 = vmatpush.bf16.msra.mxu2 %v479_v9  ;;  %v461_v40 = vld [vmem:[%s736_s0 + $0x14] sm:$0xf0]  ;;  %v392_v41 = vld [vmem:[%s736_s0 + $0x50] sm:$0xf]  ;;  %v413_v43 = vor.u32 %v472_v36, %v410_v37  ;;  %v464_v46 = vld [vmem:[%s736_s0 + $0x34] sm:$0xf] }
   0xb   :  { %v469_v42 = vld [vmem:[%s736_s0 + $0x54] sm:$0xf0]  ;;  %v361_v44 = vor.u32 %v461_v40, %v360_v39  ;;  %v378_v47 = vld [vmem:[%s736_s0 + $0x38] sm:$0xf0]  ;;  %v368_v49 = vld [vmem:[%s736_s0 + $0x20] sm:$0xf] }
   0xc   :  { %271 = vmatpush.bf16.msra.mxu1 %v482_v10  ;;  %492 = vmatpush.bf16.msra.mxu3 %v482_v10  ;;  %v393_v45 = vor.u32 %v469_v42, %v392_v41  ;;  %v381_v48 = vor.u32 %v464_v46, %v378_v47  ;;  %v463_v50 = vld [vmem:[%s736_s0 + $0x24] sm:$0xf0]  ;;  %v400_v51 = vld [vmem:[%s736_s0 + $0x60] sm:$0xf]  ;;  %v466_v55 = vld [vmem:[%s736_s0 + $0x44] sm:$0xf] }
   0xd   :  { %v471_v52 = vld [vmem:[%s736_s0 + $0x64] sm:$0xf0]  ;;  %v369_v53 = vor.u32 %v463_v50, %v368_v49  ;;  %v386_v56 = vld [vmem:[%s736_s0 + $0x48] sm:$0xf0]  ;;  %v376_v58 = vld [vmem:[%s736_s0 + $0x30] sm:$0xf] }
   0xe   :  { %218 = vmatpush.bf16.msra.mxu0 %v478_v16  ;;  %486 = vmatpush.bf16.msra.mxu2 %v478_v16  ;;  %v401_v54 = vor.u32 %v471_v52, %v400_v51  ;;  %v389_v57 = vor.u32 %v466_v55, %v386_v56  ;;  %v465_v59 = vld [vmem:[%s736_s0 + $0x34] sm:$0xf0]  ;;  %v408_v60 = vld [vmem:[%s736_s0 + $0x70] sm:$0xf]  ;;  %v653_v3 = vld [vmem:[%s737_s2] ss:$0 sm:$0xff] }
   0xf   :  { %450 = vmatmul.msk.bf16.vlgmr.msra.gmra.mxu1 %vm183_vm2, %v357_v15  ;;  %455 = vmatmul.msk.bf16.vlgmr.msra.gmra.mxu3 %vm183_vm2, %v397_v17  ;;  %v473_v61 = vld [vmem:[%s736_s0 + $0x74] sm:$0xf0]  ;;  %v377_v62 = vor.u32 %v465_v59, %v376_v58 }
  0x10   :  { %v409_v63 = vor.u32 %v473_v61, %v408_v60 }
  0x12   :  { %219 = vmatpush.bf16.msra.mxu0 %v477_v18  ;;  %487 = vmatpush.bf16.msra.mxu2 %v477_v18 }
  0x16   :  { %220 = vmatpush.bf16.msra.mxu0 %v476_v19  ;;  %488 = vmatpush.bf16.msra.mxu2 %v476_v19 }
  0x1a   :  { %221 = vmatpush.bf16.msra.mxu0 %v475_v20  ;;  %489 = vmatpush.bf16.msra.mxu2 %v475_v20 }
  0x1e   :  { %222 = vmatpush.bf16.msra.mxu0 %v474_v26  ;;  %490 = vmatpush.bf16.msra.mxu2 %v474_v26 }
  0x1f   :  { %451 = vmatmul.msk.bf16.gmra.mxu1 %vm183_vm2, %v365_v25  ;;  %456 = vmatmul.msk.bf16.gmra.mxu3 %vm183_vm2, %v405_v31 }
  0x21   :  { %223 = vmatmul.bf16.vlgmr.msra.gmra.mxu0 %v353_v32  ;;  %243 = vmatmul.bf16.vlgmr.msra.gmra.mxu2 %v385_v33 }
  0x2f   :  { %452 = vmatmul.msk.bf16.gmra.mxu1 %vm183_vm2, %v373_v38  ;;  %457 = vmatmul.msk.bf16.gmra.mxu3 %vm183_vm2, %v413_v43 }
  0x31   :  { %228 = vmatmul.bf16.gmra.mxu0 %v361_v44  ;;  %248 = vmatmul.bf16.gmra.mxu2 %v393_v45 }
  0x3f   :  { %453 = vmatmul.msk.bf16.gmra.mxu1 %vm183_vm2, %v381_v48 }
  0x41   :  { %233 = vmatmul.bf16.gmra.mxu0 %v369_v53  ;;  %253 = vmatmul.bf16.gmra.mxu2 %v401_v54 }
  0x4f   :  { %454 = vmatmul.msk.bf16.gmra.mxu1 %vm183_vm2, %v389_v57 }
  0x51   :  { %238 = vmatmul.bf16.gmra.mxu0 %v377_v62  ;;  %258 = vmatmul.bf16.gmra.mxu2 %v409_v63 }
  0x8c   :  { %v273_v0 = vpop.f32.mrf.mxu1 }
  0x92   :  { %v298_v16 = vpop.f32.mrf.mxu3 }
  0x94   :  { %v275_v1 = vpop.f32.mrf.mxu1 }
  0x9a   :  { %v300_v26 = vpop.f32.mrf.mxu3 }
  0x9c   :  { %v278_v2 = vpop.f32.mrf.mxu1 }
  0x9e   :  { %v224_v4 = vpop.f32.mrf.mxu0 }
  0x9f   :  { %v225_v5 = vadd.f32 %v653_v3, %v224_v4 }
  0xa1   :  { %v274_v6 = vadd.f32 %v273_v0, %v225_v5 }
  0xa2   :  { %v303_v38 = vpop.f32.mrf.mxu3 }
  0xa3   :  { %v313_v7 = vmax.f32 %v274_v6, 0.0 }
  0xa4   :  { %v280_v8 = vpop.f32.mrf.mxu1  ;;  %v244_v9 = vpop.f32.mrf.mxu2 }
  0xa5   :  { %330 = vst.msk [vmem:[%s738_s3] sm:$0xff] %vm329_vm3, %v313_v7  ;;  %v245_v48 = vadd.f32 %v653_v3, %v244_v9 }
  0xa6   :  { %v226_v10 = vpop.f32.mrf.mxu0 }
  0xa7   :  { %v227_v11 = vadd.f32 %v653_v3, %v226_v10 }
  0xa9   :  { %v276_v12 = vadd.f32 %v275_v1, %v227_v11 }
  0xaa   :  { %v305_v51 = vpop.f32.mrf.mxu3 }
  0xab   :  { %v314_v13 = vmax.f32 %v276_v12, 0.0 }
  0xac   :  { %v283_v14 = vpop.f32.mrf.mxu1  ;;  %v246_v15 = vpop.f32.mrf.mxu2 }
  0xad   :  { %331 = vst.msk [vmem:[%s738_s3 + $0x8] sm:$0xff] %vm329_vm3, %v314_v13  ;;  %v247_v61 = vadd.f32 %v653_v3, %v246_v15 }
  0xae   :  { %v229_v17 = vpop.f32.mrf.mxu0 }
  0xaf   :  { %v230_v18 = vadd.f32 %v653_v3, %v229_v17 }
  0xb1   :  { %v279_v19 = vadd.f32 %v278_v2, %v230_v18 }
  0xb2   :  { %v308_v2 = vpop.f32.mrf.mxu3 }
  0xb3   :  { %v315_v20 = vmax.f32 %v279_v19, 0.0 }
  0xb4   :  { %v285_v21 = vpop.f32.mrf.mxu1  ;;  %v249_v22 = vpop.f32.mrf.mxu2 }
  0xb5   :  { %332 = vst.msk [vmem:[%s738_s3 + $0x10] sm:$0xff] %vm329_vm3, %v315_v20  ;;  %v250_v23 = vadd.f32 %v653_v3, %v249_v22 }
  0xb6   :  { %v231_v24 = vpop.f32.mrf.mxu0 }
  0xb7   :  { %v232_v25 = vadd.f32 %v653_v3, %v231_v24  ;;  %v299_v27 = vadd.f32 %v298_v16, %v250_v23 }
  0xb9   :  { %v281_v28 = vadd.f32 %v280_v8, %v232_v25  ;;  %v323_v29 = vmax.f32 %v299_v27, 0.0 }
  0xba   :  { %v310_v15 = vpop.f32.mrf.mxu3 }
  0xbb   :  { %v316_v30 = vmax.f32 %v281_v28, 0.0  ;;  %340 = vst.msk [vmem:[%s738_s3 + $0x50] sm:$0xff] %vm329_vm3, %v323_v29 }
  0xbc   :  { %v288_v31 = vpop.f32.mrf.mxu1  ;;  %v251_v32 = vpop.f32.mrf.mxu2 }
  0xbd   :  { %333 = vst.msk [vmem:[%s738_s3 + $0x18] sm:$0xff] %vm329_vm3, %v316_v30  ;;  %v252_v33 = vadd.f32 %v653_v3, %v251_v32 }
  0xbe   :  { %v234_v34 = vpop.f32.mrf.mxu0 }
  0xbf   :  { %v235_v35 = vadd.f32 %v653_v3, %v234_v34  ;;  %v301_v36 = vadd.f32 %v300_v26, %v252_v33 }
  0xc1   :  { %v284_v37 = vadd.f32 %v283_v14, %v235_v35  ;;  %v324_v39 = vmax.f32 %v301_v36, 0.0 }
  0xc3   :  { %v317_v40 = vmax.f32 %v284_v37, 0.0  ;;  %341 = vst.msk [vmem:[%s738_s3 + $0x58] sm:$0xff] %vm329_vm3, %v324_v39 }
  0xc4   :  { %v290_v41 = vpop.f32.mrf.mxu1  ;;  %v254_v42 = vpop.f32.mrf.mxu2 }
  0xc5   :  { %334 = vst.msk [vmem:[%s738_s3 + $0x20] sm:$0xff] %vm329_vm3, %v317_v40  ;;  %v255_v43 = vadd.f32 %v653_v3, %v254_v42 }
  0xc6   :  { %v236_v44 = vpop.f32.mrf.mxu0 }
  0xc7   :  { %v237_v45 = vadd.f32 %v653_v3, %v236_v44  ;;  %v304_v46 = vadd.f32 %v303_v38, %v255_v43 }
  0xc9   :  { %v286_v47 = vadd.f32 %v285_v21, %v237_v45  ;;  %v325_v49 = vmax.f32 %v304_v46, 0.0 }
  0xcb   :  { %v318_v50 = vmax.f32 %v286_v47, 0.0  ;;  %342 = vst.msk [vmem:[%s738_s3 + $0x60] sm:$0xff] %vm329_vm3, %v325_v49 }
  0xcc   :  { %v293_v52 = vpop.f32.mrf.mxu1  ;;  %v256_v54 = vpop.f32.mrf.mxu2 }
  0xcd   :  { %v294_v53 = vadd.f32 %v293_v52, %v245_v48  ;;  %335 = vst.msk [vmem:[%s738_s3 + $0x28] sm:$0xff] %vm329_vm3, %v318_v50  ;;  %v257_v56 = vadd.f32 %v653_v3, %v256_v54 }
  0xce   :  { %v239_v57 = vpop.f32.mrf.mxu0 }
  0xcf   :  { %v321_v55 = vmax.f32 %v294_v53, 0.0  ;;  %v240_v58 = vadd.f32 %v653_v3, %v239_v57  ;;  %v306_v59 = vadd.f32 %v305_v51, %v257_v56 }
  0xd1   :  { %338 = vst.msk [vmem:[%s738_s3 + $0x40] sm:$0xff] %vm329_vm3, %v321_v55  ;;  %v289_v60 = vadd.f32 %v288_v31, %v240_v58  ;;  %v326_v62 = vmax.f32 %v306_v59, 0.0 }
  0xd3   :  { %v319_v63 = vmax.f32 %v289_v60, 0.0  ;;  %343 = vst.msk [vmem:[%s738_s3 + $0x68] sm:$0xff] %vm329_vm3, %v326_v62 }
  0xd4   :  { %v295_v0 = vpop.f32.mrf.mxu1  ;;  %v259_v4 = vpop.f32.mrf.mxu2 }
  0xd5   :  { %v296_v1 = vadd.f32 %v295_v0, %v247_v61  ;;  %336 = vst.msk [vmem:[%s738_s3 + $0x30] sm:$0xff] %vm329_vm3, %v319_v63  ;;  %v260_v6 = vadd.f32 %v653_v3, %v259_v4 }
  0xd6   :  { %v241_v7 = vpop.f32.mrf.mxu0 }
  0xd7   :  { %v322_v5 = vmax.f32 %v296_v1, 0.0  ;;  %v242_v8 = vadd.f32 %v653_v3, %v241_v7  ;;  %v309_v9 = vadd.f32 %v308_v2, %v260_v6 }
  0xd9   :  { %339 = vst.msk [vmem:[%s738_s3 + $0x48] sm:$0xff] %vm329_vm3, %v322_v5  ;;  %v291_v10 = vadd.f32 %v290_v41, %v242_v8  ;;  %v327_v11 = vmax.f32 %v309_v9, 0.0 }
  0xdb   :  { %v320_v12 = vmax.f32 %v291_v10, 0.0  ;;  %344 = vst.msk [vmem:[%s738_s3 + $0x70] sm:$0xff] %vm329_vm3, %v327_v11 }
  0xdc   :  { %v261_v13 = vpop.f32.mrf.mxu2 }
  0xdd   :  { %337 = vst.msk [vmem:[%s738_s3 + $0x38] sm:$0xff] %vm329_vm3, %v320_v12  ;;  %v262_v14 = vadd.f32 %v653_v3, %v261_v13 }
  0xdf   :  { %v311_v16 = vadd.f32 %v310_v15, %v262_v14 }
  0xe1   :  { %v328_v17 = vmax.f32 %v311_v16, 0.0 }
  0xe3   :  { %345 = vst.msk [vmem:[%s738_s3 + $0x78] sm:$0xff] %vm329_vm3, %v328_v17 }

// kernel: resnext_bottom_forward.7
= control target key start
LH: loop header
LB: loop body
LE: loop exit
PB: predicated region body
PF: predicated region fallthrough
CT: control target
= control target key end

     0   :  { %6 = vsyncpa [#allocation3], 0  ;;  %s415_s0 = inlined_call_operand.vmem [shape: f32[2,16,64], index: 0, kind: input, shape index: {}]   ;;  %s416_s1 = inlined_call_operand.hbm [shape: f32[2,1,64], index: 1, kind: output, shape index: {}]  }
   0x1   :  { %8 = vsyncpa [#allocation3 + $0x1], 0  ;;  %s330_s6 = smov 0   ;;  %s332_s7 = smov 0  }
   0x2   :  { %s334_s8 = smov 0   ;;  %s336_s9 = smov 0  }
   0x3 LB: > { %s351_s10 = sadd.s32 4294967295, %s317_s9   ;;  %s204_s11 = sadd.s32 4294967294, %s317_s9   ;;  %s317_s9 = sphi %s336_s9, %s422_s9   ;;  %s313_s8 = sphi %s334_s8, %s421_s8   ;;  %s309_s7 = sphi %s332_s7, %s420_s7   ;;  %s305_s6 = sphi %s330_s6, %s419_s6  }
   0x4   : > { %s355_s12 = sadd.s32 1, %s317_s9   ;;  %s47_s13 = sadd.s32 1, %s313_s8 }
   0x5   : > { %s44_s14 = ssub.s32 %s317_s9, %s355_s12  ;;  %p57_p0 = scmp.ne.s32.totalorder %s313_s8, %s309_s7 }
   0x6   : > { %p45_p1 = scmp.eq.s32.totalorder %s44_s14, 0  ;;  %p58_p2 = scmp.eq.s32.totalorder %s351_s10, 1 }
   0x7   : > { %p63_p3 = scmp.ne.s32.totalorder %s309_s7, %s305_s6  ;;  %p64_p4 = scmp.eq.s32.totalorder %s204_s11, 1 }
   0x8   : > { %s366_s15 = scalar_select %p45_p1, %s313_s8, %s47_s13  }
   0x9   : > { %p368_p5 = por %p58_p2, %p57_p0  ;;  %p372_p6 = por %p64_p4, %p63_p3 }
   0xa   : > { %p207_p7 = scmp.ge.s32.totalorder %s317_s9, 1  ;;  %p90_p8 = scmp.lt.s32.totalorder %s317_s9, 3 }
   0xc   : > { %p91_p9 = pnand %p207_p7, %p90_p8 }
   0xd   : > { %p109_p10 = scmp.lt.s32.totalorder (!%p91_p9), %s351_s10, 1  ;;  %s107_s23 = sand.u32 (!%p91_p9), 1, %s309_s7  }
   0xe   : > { %94 = sbr.rel (%p91_p9) target bundleno = 44 (0x2c), region = 24  ;;  %s145_s26 = scalar_lea.hbm (!%p91_p9), %s416_s1, %s351_s10 }
   0xf   : > { %s108_s27 = scalar_lea.vmem (!%p91_p9), [#allocation2], %s107_s23  ;;  %s149_s29 = sshll.u32 (!%p91_p9), %s145_s26, 4  ;;  %s150_s29 = int_to_ptr.hbm [resolvable:$true] %s149_s29 }
  0x10   : > { %s147_s28 = sshll.u32 (!%p91_p9), %s108_s27, 4  ;;  %s137_s30 = scalar_lea.sflag (!%p91_p9), [#allocation3], %s107_s23  ;;  %s148_s28 = int_to_ptr.vmem [resolvable:$true] %s147_s28 }
  0x11   : > { %s269_s2 = sshra.s32 (!%p91_p9), %s150_s29, 4  ;;  %s270_s2 = int_to_ptr.hbm [resolvable:$true] %s269_s2 }
  0x12   : > { %s271_s3 = scalar_lea.hbm (!%p91_p9), %s270_s2, 1  ;;  %p276_p0 = scmp.lt.s32.totalorder (!%p91_p9), %s270_s2, %s416_s1 }
  0x13   : > { %v319_v0 = vmov 16.0   ;;  %s110_s18 = scalar_select %p109_p10, %s351_s10, 1  ;;  %vm116_vm0 = vcmask 523264   ;;  %vm134_vm2 = vcmask 516096  }
  0x14   : > { %253 = vrcp.f32 %v319_v0  ;;  %p272_p11 = scmp.ne.s32.totalorder %s270_s2, %s271_s3  ;;  %s275_s10 = scalar_lea.hbm %s416_s1, 2 }
  0x15   : > { %s212_s19 = sshll.u32 %s110_s18, 4  ;;  %p277_p1 = scmp.lt.s32.totalorder %s275_s10, %s271_s3 }
  0x16   : > { %s113_s22 = scalar_lea.vmem %s415_s0, %s212_s19  ;;  %p273_p12 = pnand %p272_p11, %p368_p5 }
  0x17   : > { %v114_v1 = vld [vmem:[%s113_s22] sm:$0xff]  ;;  %v115_v2 = vld [vmem:[%s113_s22 + $0x8] sm:$0xff]  ;;  %p278_p2 = por %p277_p1, %p276_p0 }
  0x18   : > { %v117_v4 = vsel %vm116_vm0, %v114_v1, 0.0  ;;  %v118_v5 = vsel %vm116_vm0, %v115_v2, 0.0  ;;  %p274_p13 = pneg %p273_p12 }
  0x19   : > { %v119_v6 = vadd.f32 %v118_v5, %v117_v4 }
  0x1a   : > { %v254_v3 = vpop.eup %253  ;;  %p279_p3 = pnand %p278_p2, %p274_p13 }
  0x1b   : > { %v127_v7 = vmul.f32 16.0, %v254_v3  ;;  %v120_v8 = vrot.slane %v119_v6, 4  ;;  %vm131_vm1 = vweird.f32 %v254_v3 }
  0x1d   : > { %v128_v9 = vsub.f32 1.0, %v127_v7  ;;  %v121_v10 = vadd.f32 %v120_v8, %v119_v6 }
  0x1f   : > { %v129_v11 = vmul.f32 %v254_v3, %v128_v9  ;;  %v122_v12 = vrot.slane %v121_v10, 2 }
  0x21   : > { %v130_v13 = vadd.f32 %v254_v3, %v129_v11  ;;  %v123_v14 = vadd.f32 %v122_v12, %v121_v10 }
  0x23   : > { %v124_v15 = vrot.slane %v123_v14, 1  ;;  %v132_v16 = vsel %vm131_vm1, %v254_v3, %v130_v13 }
  0x25   : > { %v125_v17 = vadd.f32 %v124_v15, %v123_v14 }
  0x27   : > { %v133_v18 = vmul.f32 %v132_v16, %v125_v17 }
  0x29   : > { %135 = vst.msk [vmem:[%s108_s27] sm:$0x1] %vm134_vm2, %v133_v18 }
  0x2a   : > { %282 = shalt.err (!%p279_p3)
}
  0x2b   : > { %213 = dma.vmem_to_hbm [thread:$0]  (%p368_p5), %s148_s28, 16, %s150_s29, %s137_s30  }
  0x2c PF: > { %p219_p4 = scmp.ge.s32.totalorder %s317_s9, 2  ;;  %s161_s14 = sand.u32 1, %s305_s6  }
  0x2d   : > { %s162_s18 = scalar_lea.sflag [#allocation3], %s161_s14 }
  0x2e   : > { %p216_p7 = pnand %p219_p4, %p372_p6 }
  0x30   : > { %p217_p8 = pneg %p216_p7 }
  0x32   : > { %300 = dma.done.wait (%p217_p8), %s162_s18, 16  }
  0x33   : > { %302 = vsyncadd (%p217_p8), %s162_s18, 4294967280  ;;  %p11_p9 = scmp.ge.s32.totalorder %s355_s12, 4   ;;  %s419_s6 = smov %s309_s7 }
  0x34   : > { %s420_s7 = smov %s313_s8  ;;  %s421_s8 = smov %s366_s15 }
  0x35   : > { %s422_s9 = smov %s355_s12  ;;  %13 = sbr.rel (!%p11_p9) target bundleno = 3 (0x3), region = 59 }
  0x3a   :  { %167 = vsyncpa [#allocation3], 1 }
  0x3b   :  { %169 = vsyncpa [#allocation3 + $0x1], 1 }

// kernel: resnext_bottom_forward.6
= control target key start
LH: loop header
LB: loop body
LE: loop exit
PB: predicated region body
PF: predicated region fallthrough
CT: control target
= control target key end

     0   :  { %vm213_vm0 = vcmask 261120   ;;  %vm309_vm1 = vcmask 130048   ;;  %vm384_vm2 = vcmask 523264   ;;  %s720_s2 = inlined_call_operand.vmem [shape: bf16[288,32], index: 2, kind: input, shape index: {}]   ;;  %s721_s0 = inlined_call_operand.vmem [shape: bf16[32,288], index: 0, kind: input, shape index: {}]   ;;  %s722_s5 = inlined_call_operand.vmem [shape: bf16[16,64], index: 5, kind: input, shape index: {}]   ;;  %s723_s3 = inlined_call_operand.vmem [shape: f32[1,32], index: 3, kind: input, shape index: {}]   ;;  %s724_s1 = inlined_call_operand.vmem [shape: bf16[32,16], index: 1, kind: input, shape index: {}]   ;;  %s725_s4 = inlined_call_operand.vmem [shape: bf16[32,64], index: 4, kind: input, shape index: {}]   ;;  %s726_s6 = inlined_call_operand.vmem [shape: f32[1,64], index: 6, kind: input, shape index: {}]   ;;  %s727_s7 = inlined_call_operand.vmem [shape: f32[32,64], index: 7, kind: output, shape index: {}]  }
   0x1   :  { %v528_v0 = vld [vmem:[%s720_s2 + $0x38] sm:$0xff]  ;;  %v527_v2 = vld [vmem:[%s720_s2 + $0x30] sm:$0xff]  ;;  %v538_v4 = vld [vmem:[%s720_s2 + $0x88] sm:$0xff] }
   0x2   :  { %v536_v1 = vld [vmem:[%s720_s2 + $0x78] sm:$0xff]  ;;  %220 = vmatpush.bf16.msra.mxu0 %v528_v0  ;;  %v535_v3 = vld [vmem:[%s720_s2 + $0x70] sm:$0xff]  ;;  %264 = vmatpush.bf16.msra.mxu2 %v538_v4  ;;  %v537_v5 = vld [vmem:[%s720_s2 + $0x80] sm:$0xff] }
   0x3   :  { %239 = vmatpush.bf16.msra.mxu1 %v536_v1  ;;  %v403_v6 = vld [vmem:[%s721_s0 + $0x8] sm:$0xf]  ;;  %v517_v7 = vld [vmem:[%s721_s0 + $0x10] sm:$0xf0]  ;;  %v525_v11 = vld [vmem:[%s720_s2 + $0x20] sm:$0xff] }
   0x4   :  { %v526_v8 = vld [vmem:[%s720_s2 + $0x28] sm:$0xff]  ;;  %v404_v10 = vor.u32 %v517_v7, %v403_v6  ;;  %v533_v12 = vld [vmem:[%s720_s2 + $0x60] sm:$0xff]  ;;  %v524_v13 = vld [vmem:[%s720_s2 + $0x18] sm:$0xff] }
   0x5   :  { %v534_v9 = vld [vmem:[%s720_s2 + $0x68] sm:$0xff]  ;;  %v532_v14 = vld [vmem:[%s720_s2 + $0x58] sm:$0xff]  ;;  %v543_v15 = vld [vmem:[%s722_s5] sm:$0xff] }
   0x6   :  { %221 = vmatpush.bf16.msra.mxu0 %v527_v2  ;;  %265 = vmatpush.bf16.msra.mxu2 %v537_v5  ;;  %v523_v16 = vld [vmem:[%s720_s2 + $0x10] sm:$0xff]  ;;  %v542_v18 = vld [vmem:[%s724_s1 + $0x8] sm:$0xff]  ;;  %v415_v19 = vld [vmem:[%s721_s0 + $0x20] sm:$0xf] }
   0x7   :  { %240 = vmatpush.bf16.msra.mxu1 %v535_v3  ;;  %v531_v17 = vld [vmem:[%s720_s2 + $0x50] sm:$0xff]  ;;  %544 = vmatpush.bf16.msra.mxu3 %v543_v15  ;;  %v520_v20 = vld [vmem:[%s721_s0 + $0x28] sm:$0xf0]  ;;  %v521_v24 = vld [vmem:[%s720_s2] sm:$0xff] }
   0x8   :  { %v522_v21 = vld [vmem:[%s720_s2 + $0x8] sm:$0xff]  ;;  %v416_v23 = vor.u32 %v520_v20, %v415_v19  ;;  %v529_v25 = vld [vmem:[%s720_s2 + $0x40] sm:$0xff]  ;;  %v397_v29 = vld [vmem:[%s721_s0 + $0xc] sm:$0xf0] }
   0x9   :  { %489 = vmatmul.msk.bf16.vlgmr.msra.gmra.mxu2 %vm213_vm0, %v404_v10  ;;  %v530_v22 = vld [vmem:[%s720_s2 + $0x48] sm:$0xff]  ;;  %v395_v26 = vld [vmem:[%s721_s0] sm:$0xf]  ;;  %v515_v28 = vld [vmem:[%s721_s0 + $0x4] sm:$0xf] }
   0xa   :  { %222 = vmatpush.bf16.msra.mxu0 %v526_v8  ;;  %323 = vmatpush.bf16.msrb.mxu2 %v543_v15  ;;  %v516_v27 = vld [vmem:[%s721_s0 + $0x8] sm:$0xf0]  ;;  %v400_v31 = vor.u32 %v515_v28, %v397_v29  ;;  %v407_v32 = vld [vmem:[%s721_s0 + $0x18] sm:$0xf]  ;;  %v519_v33 = vld [vmem:[%s721_s0 + $0x20] sm:$0xf0] }
   0xb   :  { %241 = vmatpush.bf16.msra.mxu1 %v534_v9  ;;  %504 = vmatmul.msk.bf16.vlgmr.msra.gmra.mxu3 %vm309_vm1, %v542_v18  ;;  %v396_v30 = vor.u32 %v516_v27, %v395_v26  ;;  %v518_v34 = vld [vmem:[%s721_s0 + $0x1c] sm:$0xf]  ;;  %v409_v35 = vld [vmem:[%s721_s0 + $0x24] sm:$0xf0]  ;;  %v408_v36 = vor.u32 %v519_v33, %v407_v32  ;;  %v539_v39 = vld [vmem:[%s725_s4] sm:$0xff] }
   0xc   :  { %v412_v37 = vor.u32 %v518_v34, %v409_v35  ;;  %v540_v38 = vld [vmem:[%s725_s4 + $0x8] sm:$0xff]  ;;  %v541_v40 = vld [vmem:[%s724_s1] sm:$0xff] }
   0xd   :  { %359 = vmatpush.bf16.msrb.mxu3 %v540_v38  ;;  %v545_v42 = vld [vmem:[%s723_s3] ss:$0 sm:$0xff] }
   0xe   :  { %223 = vmatpush.bf16.msra.mxu0 %v525_v11  ;;  %v546_v11 = vld [vmem:[%s726_s6] ss:$0 sm:$0xff] }
   0xf   :  { %242 = vmatpush.bf16.msra.mxu1 %v533_v12 }
  0x11   :  { %360 = vmatpush.bf16.msrb.mxu3 %v539_v39 }
  0x12   :  { %224 = vmatpush.bf16.msra.mxu0 %v524_v13 }
  0x13   :  { %243 = vmatpush.bf16.msra.mxu1 %v532_v14 }
  0x16   :  { %225 = vmatpush.bf16.msra.mxu0 %v523_v16 }
  0x17   :  { %244 = vmatpush.bf16.msra.mxu1 %v531_v17 }
  0x19   :  { %490 = vmatmul.msk.bf16.gmra.mxu2 %vm213_vm0, %v416_v23 }
  0x1a   :  { %226 = vmatpush.bf16.msra.mxu0 %v522_v21 }
  0x1b   :  { %245 = vmatpush.bf16.msra.mxu1 %v530_v22 }
  0x1e   :  { %227 = vmatpush.bf16.msra.mxu0 %v521_v24 }
  0x1f   :  { %246 = vmatpush.bf16.msra.mxu1 %v529_v25 }
  0x21   :  { %228 = vmatmul.bf16.vlgmr.msra.gmra.mxu0 %v396_v30 }
  0x22   :  { %247 = vmatmul.bf16.vlgmr.msra.gmra.mxu1 %v400_v31 }
  0x29   :  { %503 = vmatmul.msk.bf16.vlgmr.msrb.gmra.mxu2 %vm309_vm1, %v541_v40 }
  0x31   :  { %233 = vmatmul.bf16.gmra.mxu0 %v408_v36 }
  0x32   :  { %252 = vmatmul.bf16.gmra.mxu1 %v412_v37 }
  0x8c   :  { %v267_v41 = vpop.f32.mrf.mxu2 }
  0x8e   :  { %v330_v8 = vpop.f32.mrf.mxu3 }
  0x94   :  { %v269_v47 = vpop.f32.mrf.mxu2 }
  0x96   :  { %v332_v9 = vpop.f32.mrf.mxu3 }
  0x9c   :  { %v272_v59 = vpop.f32.mrf.mxu2 }
  0x9e   :  { %v229_v43 = vpop.f32.mrf.mxu0 }
  0x9f   :  { %v248_v44 = vpop.f32.mrf.mxu1  ;;  %v230_v45 = vadd.f32 %v545_v42, %v229_v43 }
  0xa1   :  { %v249_v46 = vadd.f32 %v248_v44, %v230_v45 }
  0xa3   :  { %v268_v51 = vadd.f32 %v267_v41, %v249_v46 }
  0xa4   :  { %v274_v3 = vpop.f32.mrf.mxu2 }
  0xa5   :  { %v277_v54 = vmax.f32 %v268_v51, 0.0 }
  0xa6   :  { %v231_v48 = vpop.f32.mrf.mxu0 }
  0xa7   :  { %v250_v49 = vpop.f32.mrf.mxu1  ;;  %v232_v50 = vadd.f32 %v545_v42, %v231_v48 }
  0xa9   :  { %v251_v52 = vadd.f32 %v250_v49, %v232_v50 }
  0xab   :  { %v270_v53 = vadd.f32 %v269_v47, %v251_v52 }
  0xac   :  { %v325_v10 = vpop.f32.mrf.mxu2 }
  0xad   :  { %v278_v55 = vmax.f32 %v270_v53, 0.0 }
  0xae   :  { %v234_v56 = vpop.f32.mrf.mxu0 }
  0xaf   :  { %v253_v57 = vpop.f32.mrf.mxu1  ;;  %v281_v58 = vpack.c.bf16 %v278_v55, %v277_v54  ;;  %v235_v60 = vadd.f32 %v545_v42, %v234_v56 }
  0xb1   :  { %513 = vmatmul.msk.bf16.vlgmr.msrb.gmra.mxu3 %vm213_vm0, %v281_v58  ;;  %v254_v61 = vadd.f32 %v253_v57, %v235_v60 }
  0xb3   :  { %v273_v1 = vadd.f32 %v272_v59, %v254_v61 }
  0xb4   :  { %v327_v16 = vpop.f32.mrf.mxu2 }
  0xb5   :  { %v279_v5 = vmax.f32 %v273_v1, 0.0 }
  0xb6   :  { %v236_v62 = vpop.f32.mrf.mxu0 }
  0xb7   :  { %v237_v63 = vadd.f32 %v545_v42, %v236_v62  ;;  %v255_v0 = vpop.f32.mrf.mxu1 }
  0xb9   :  { %v256_v2 = vadd.f32 %v255_v0, %v237_v63 }
  0xbb   :  { %v275_v4 = vadd.f32 %v274_v3, %v256_v2 }
  0xbd   :  { %v280_v6 = vmax.f32 %v275_v4, 0.0 }
  0xbf   :  { %v282_v7 = vpack.c.bf16 %v280_v6, %v279_v5 }
  0xc1   :  { %514 = vmatmul.msk.bf16.gmra.mxu3 %vm213_vm0, %v282_v7 }
 0x134   :  { %v362_v12 = vpop.f32.mrf.mxu3 }
 0x135   :  { %v363_v13 = vadd.f32 %v362_v12, %v325_v10 }
 0x137   :  { %v376_v14 = vadd.f32 %v546_v11, %v363_v13 }
 0x139   :  { %v380_v15 = vmax.f32 %v376_v14, 0.0 }
 0x13b   :  { %385 = vst.msk [vmem:[%s727_s7] sm:$0xff] %vm384_vm2, %v380_v15 }
 0x13c   :  { %v364_v17 = vpop.f32.mrf.mxu3 }
 0x13d   :  { %v365_v18 = vadd.f32 %v364_v17, %v327_v16 }
 0x13f   :  { %v377_v19 = vadd.f32 %v546_v11, %v365_v18 }
 0x141   :  { %v381_v20 = vmax.f32 %v377_v19, 0.0 }
 0x143   :  { %386 = vst.msk [vmem:[%s727_s7 + $0x8] sm:$0xff] %vm384_vm2, %v381_v20 }
 0x144   :  { %v367_v21 = vpop.f32.mrf.mxu3 }
 0x145   :  { %v368_v22 = vadd.f32 %v367_v21, %v330_v8 }
 0x147   :  { %v378_v23 = vadd.f32 %v546_v11, %v368_v22 }
 0x149   :  { %v382_v24 = vmax.f32 %v378_v23, 0.0 }
 0x14b   :  { %387 = vst.msk [vmem:[%s727_s7 + $0x10] sm:$0xff] %vm384_vm2, %v382_v24 }
 0x14c   :  { %v369_v25 = vpop.f32.mrf.mxu3 }
 0x14d   :  { %v370_v26 = vadd.f32 %v369_v25, %v332_v9 }
 0x14f   :  { %v379_v27 = vadd.f32 %v546_v11, %v370_v26 }
 0x151   :  { %v383_v28 = vmax.f32 %v379_v27, 0.0 }
 0x153   :  { %388 = vst.msk [vmem:[%s727_s7 + $0x18] sm:$0xff] %vm384_vm2, %v383_v28 }

</bundles_post_ra>
